<compile_context>
chip_gen: v6e
topology: v6e:2x2x1
jax: 0.10.0
libtpu: 0.0.40
codegen_flags: <defaults>
</compile_context>

<pallas_src>
import jax
import jax.numpy as jnp
from jax.experimental import pallas as pl
from jax.experimental.pallas import tpu as pltpu


def dqn_kernel(x_ref,
               w1_ref, b1_ref,
               w2_ref, b2_ref,
               w3_ref, b3_ref,
               w4_ref, b4_ref,
               o_ref):
    # One batch tile per grid step. Four MXU matmuls with f32 accumulation,
    # VPU ReLUs on the f32 accumulator, natural (unpadded) feature widths.
    x = x_ref[...].astype(w1_ref.dtype)
    h = jnp.dot(x, w1_ref[...], preferred_element_type=jnp.float32) + b1_ref[...]
    h = jnp.maximum(h, 0.0)

    h = jnp.dot(h.astype(w2_ref.dtype), w2_ref[...],
                preferred_element_type=jnp.float32) + b2_ref[...]
    h = jnp.maximum(h, 0.0)

    h = jnp.dot(h.astype(w3_ref.dtype), w3_ref[...],
                preferred_element_type=jnp.float32) + b3_ref[...]
    h = jnp.maximum(h, 0.0)

    out = jnp.dot(h.astype(w4_ref.dtype), w4_ref[...],
                  preferred_element_type=jnp.float32) + b4_ref[...]
    o_ref[...] = out.astype(o_ref.dtype)


def pack_params(params, dtype=jnp.float32):
    """Prepare params for the kernel. No zero padding; optional bf16 weights.

    Expects JAX-style layout: w_i of shape (in, out), b_i of shape (1, out).
    """
    packed = {}
    for i in range(1, 5):
        packed[f"w{i}"] = params[f"w{i}"].astype(dtype)
        packed[f"b{i}"] = params[f"b{i}"].astype(jnp.float32)  # added to f32 acc
    return packed


def convert_torch_params(torch_style):
    """Convert PyTorch nn.Linear layout ((out,in) W, (out,) b) to kernel layout."""
    out = {}
    for i in range(1, 5):
        out[f"w{i}"] = jnp.asarray(torch_style[f"w{i}"]).T              # (in, out)
        out[f"b{i}"] = jnp.asarray(torch_style[f"b{i}"]).reshape(1, -1)  # (1, out)
    return out


def _round_up(n, m):
    return ((n + m - 1) // m) * m


def dqn_forward(x, packed, *, batch_tile=4096):
    """Forward pass. x: (B, state_size) f32. packed: output of pack_params."""
    B, S = x.shape
    A = packed["w4"].shape[1]

    # Batch tile: multiple of 8 sublanes; aim for >=2 grid steps (v7x 2-TC split)
    # while capping the tile (amortizes ~0.35us/step overhead for large B).
    tb = min(batch_tile, max(8, _round_up(pl.cdiv(B, 2), 8)))
    b_pad = _round_up(B, tb)
    x_p = jnp.pad(x, ((0, b_pad - B), (0, 0))) if b_pad != B else x

    grid = (b_pad // tb,)

    # Weights/biases: full-array blocks with constant index_map -> VMEM-resident
    # across the batch grid (no re-DMA per step).  Block dims equal to the full
    # array dims are legal even when < (8, 128).
    def resident(arr):
        return pl.BlockSpec(arr.shape, lambda i: (0, 0))

    in_specs = [
        pl.BlockSpec((tb, S), lambda i: (i, 0)),            # x batch tile
        resident(packed["w1"]), resident(packed["b1"]),
        resident(packed["w2"]), resident(packed["b2"]),
        resident(packed["w3"]), resident(packed["b3"]),
        resident(packed["w4"]), resident(packed["b4"]),
    ]
    # Narrow (action_size-wide) output: tiny HBM writeback, no post-kernel
    # lane slice needed.
    out_spec = pl.BlockSpec((tb, A), lambda i: (i, 0))

    out = pl.pallas_call(
        dqn_kernel,
        out_shape=jax.ShapeDtypeStruct((b_pad, A), jnp.float32),
        grid_spec=pltpu.PrefetchScalarGridSpec(
            num_scalar_prefetch=0,
            grid=grid,
            in_specs=in_specs,
            out_specs=out_spec,
        ),
        compiler_params=pltpu.CompilerParams(
            dimension_semantics=("parallel",),     # shard batch over TCs (v7x)
            vmem_limit_bytes=32 * 1024 * 1024,     # guard for large tiles
        ),
    )(x_p,
      packed["w1"], packed["b1"],
      packed["w2"], packed["b2"],
      packed["w3"], packed["b3"],
      packed["w4"], packed["b4"])

    # Only padded batch rows (if any) need slicing off.
    return out[:B] if b_pad != B else out


def init_params(key, state_size, action_size):
    """Deterministic init mimicking PyTorch nn.Linear default U[-1/sqrt(fan_in), +1/sqrt(fan_in)]."""
    sizes = [(state_size, 128), (128, 64), (64, 32), (32, action_size)]
    params = {}
    for i, (fan_in, fan_out) in enumerate(sizes, start=1):
        key, kw, kb = jax.random.split(key, 3)
        bound = 1.0 / jnp.sqrt(jnp.float32(fan_in))
        params[f"w{i}"] = jax.random.uniform(
            kw, (fan_in, fan_out), jnp.float32, minval=-bound, maxval=bound)
        params[f"b{i}"] = jax.random.uniform(
            kb, (1, fan_out), jnp.float32, minval=-bound, maxval=bound)
    return params


def reference_forward(x, params):
    h = jnp.maximum(x @ params["w1"] + params["b1"], 0.0)
    h = jnp.maximum(h @ params["w2"] + params["b2"], 0.0)
    h = jnp.maximum(h @ params["w3"] + params["b3"], 0.0)
    return h @ params["w4"] + params["b4"]


if __name__ == "__main__":
    key = jax.random.PRNGKey(0)
    batch = 2
    state_size = 8
    action_size = 4

    key, kp, kx = jax.random.split(key, 3)
    params = init_params(kp, state_size, action_size)
    x = jax.random.normal(kx, (batch, state_size), jnp.float32)

    # Pack weights once (f32 by default; pass dtype=jnp.bfloat16 for bf16 MXU).
    packed = pack_params(params)
    fwd = jax.jit(dqn_forward)

    out = jax.block_until_ready(fwd(x, packed))

    ref = reference_forward(x, params)
    assert out.shape == (batch, action_size)
    assert jnp.allclose(out, ref, atol=1e-5, rtol=1e-5), (out, ref)

    # Sanity-check a larger, non-tile-multiple batch to exercise the multi-step
    # grid (>=2 tiles -> both v7x TensorCores active).
    key, kx2 = jax.random.split(key)
    x_big = jax.random.normal(kx2, (1031, state_size), jnp.float32)
    out_big = jax.block_until_ready(fwd(x_big, packed))
    ref_big = reference_forward(x_big, params)
    assert out_big.shape == (1031, action_size)
    assert jnp.allclose(out_big, ref_big, atol=1e-4, rtol=1e-4)

    print("KERNEL_OK")
</pallas_src>

<mosaic_0001>
module attributes {stable_mosaic.version = 11 : i64} {
  func.func @dqn_kernel(%arg0: i32, %arg1: memref<8x8xf32, #tpu.memory_space<vmem>>, %arg2: memref<8x128xf32, #tpu.memory_space<vmem>>, %arg3: memref<1x128xf32, #tpu.memory_space<vmem>>, %arg4: memref<128x64xf32, #tpu.memory_space<vmem>>, %arg5: memref<1x64xf32, #tpu.memory_space<vmem>>, %arg6: memref<64x32xf32, #tpu.memory_space<vmem>>, %arg7: memref<1x32xf32, #tpu.memory_space<vmem>>, %arg8: memref<32x4xf32, #tpu.memory_space<vmem>>, %arg9: memref<1x4xf32, #tpu.memory_space<vmem>>, %arg10: memref<8x4xf32, #tpu.memory_space<vmem>>) attributes {dimension_semantics = [#tpu.dimension_semantics<parallel>], iteration_bounds = array<i64: 1>, scalar_prefetch = 0 : i64, scratch_operands = 0 : i64, tpu.core_type = #tpu.core_type<tc>, window_params = [{transform_indices = @transform_0, window_bounds = array<i64: 8, 8>}, {pipeline_mode = #tpu.pipeline_mode<synchronous>, transform_indices = @transform_1, window_bounds = array<i64: 8, 128>}, {pipeline_mode = #tpu.pipeline_mode<synchronous>, transform_indices = @transform_2, window_bounds = array<i64: 1, 128>}, {pipeline_mode = #tpu.pipeline_mode<synchronous>, transform_indices = @transform_3, window_bounds = array<i64: 128, 64>}, {pipeline_mode = #tpu.pipeline_mode<synchronous>, transform_indices = @transform_4, window_bounds = array<i64: 1, 64>}, {pipeline_mode = #tpu.pipeline_mode<synchronous>, transform_indices = @transform_5, window_bounds = array<i64: 64, 32>}, {pipeline_mode = #tpu.pipeline_mode<synchronous>, transform_indices = @transform_6, window_bounds = array<i64: 1, 32>}, {pipeline_mode = #tpu.pipeline_mode<synchronous>, transform_indices = @transform_7, window_bounds = array<i64: 32, 4>}, {pipeline_mode = #tpu.pipeline_mode<synchronous>, transform_indices = @transform_8, window_bounds = array<i64: 1, 4>}, {transform_indices = @transform_9, window_bounds = array<i64: 8, 4>}]} {
    %c0 = arith.constant 0 : index
    %c0_0 = arith.constant 0 : index
    %0 = vector.load %arg1[%c0, %c0_0] : memref<8x8xf32, #tpu.memory_space<vmem>>, vector<8x8xf32>
    %c0_1 = arith.constant 0 : index
    %c0_2 = arith.constant 0 : index
    %1 = vector.load %arg2[%c0_1, %c0_2] : memref<8x128xf32, #tpu.memory_space<vmem>>, vector<8x128xf32>
    %cst = arith.constant dense<0.000000e+00> : vector<8x128xf32>
    %2 = tpu.matmul %0, %1, %cst {dimension_numbers = #tpu.dot_dimension_numbers<[1], [0], [0], [1], [0, 0, 1, 1], [], []>} : vector<8x8xf32>, vector<8x128xf32>, vector<8x128xf32> -> vector<8x128xf32>
    %c0_3 = arith.constant 0 : index
    %c0_4 = arith.constant 0 : index
    %3 = vector.load %arg3[%c0_3, %c0_4] : memref<1x128xf32, #tpu.memory_space<vmem>>, vector<1x128xf32>
    %4 = vector.broadcast %3 : vector<1x128xf32> to vector<8x128xf32>
    %5 = arith.addf %2, %4 : vector<8x128xf32>
    %cst_5 = arith.constant 0.000000e+00 : f32
    %6 = vector.broadcast %cst_5 : f32 to vector<8x128xf32>
    %7 = arith.maximumf %5, %6 : vector<8x128xf32>
    %c0_6 = arith.constant 0 : index
    %c0_7 = arith.constant 0 : index
    %8 = vector.load %arg4[%c0_6, %c0_7] : memref<128x64xf32, #tpu.memory_space<vmem>>, vector<128x64xf32>
    %cst_8 = arith.constant dense<0.000000e+00> : vector<8x64xf32>
    %9 = tpu.matmul %7, %8, %cst_8 {dimension_numbers = #tpu.dot_dimension_numbers<[1], [0], [0], [1], [0, 0, 1, 1], [], []>} : vector<8x128xf32>, vector<128x64xf32>, vector<8x64xf32> -> vector<8x64xf32>
    %c0_9 = arith.constant 0 : index
    %c0_10 = arith.constant 0 : index
    %10 = vector.load %arg5[%c0_9, %c0_10] : memref<1x64xf32, #tpu.memory_space<vmem>>, vector<1x64xf32>
    %11 = vector.broadcast %10 : vector<1x64xf32> to vector<8x64xf32>
    %12 = arith.addf %9, %11 : vector<8x64xf32>
    %cst_11 = arith.constant 0.000000e+00 : f32
    %13 = vector.broadcast %cst_11 : f32 to vector<8x64xf32>
    %14 = arith.maximumf %12, %13 : vector<8x64xf32>
    %c0_12 = arith.constant 0 : index
    %c0_13 = arith.constant 0 : index
    %15 = vector.load %arg6[%c0_12, %c0_13] : memref<64x32xf32, #tpu.memory_space<vmem>>, vector<64x32xf32>
    %cst_14 = arith.constant dense<0.000000e+00> : vector<8x32xf32>
    %16 = tpu.matmul %14, %15, %cst_14 {dimension_numbers = #tpu.dot_dimension_numbers<[1], [0], [0], [1], [0, 0, 1, 1], [], []>} : vector<8x64xf32>, vector<64x32xf32>, vector<8x32xf32> -> vector<8x32xf32>
    %c0_15 = arith.constant 0 : index
    %c0_16 = arith.constant 0 : index
    %17 = vector.load %arg7[%c0_15, %c0_16] : memref<1x32xf32, #tpu.memory_space<vmem>>, vector<1x32xf32>
    %18 = vector.broadcast %17 : vector<1x32xf32> to vector<8x32xf32>
    %19 = arith.addf %16, %18 : vector<8x32xf32>
    %cst_17 = arith.constant 0.000000e+00 : f32
    %20 = vector.broadcast %cst_17 : f32 to vector<8x32xf32>
    %21 = arith.maximumf %19, %20 : vector<8x32xf32>
    %c0_18 = arith.constant 0 : index
    %c0_19 = arith.constant 0 : index
    %22 = vector.load %arg8[%c0_18, %c0_19] : memref<32x4xf32, #tpu.memory_space<vmem>>, vector<32x4xf32>
    %cst_20 = arith.constant dense<0.000000e+00> : vector<8x4xf32>
    %23 = tpu.matmul %21, %22, %cst_20 {dimension_numbers = #tpu.dot_dimension_numbers<[1], [0], [0], [1], [0, 0, 1, 1], [], []>} : vector<8x32xf32>, vector<32x4xf32>, vector<8x4xf32> -> vector<8x4xf32>
    %c0_21 = arith.constant 0 : index
    %c0_22 = arith.constant 0 : index
    %24 = vector.load %arg9[%c0_21, %c0_22] : memref<1x4xf32, #tpu.memory_space<vmem>>, vector<1x4xf32>
    %25 = vector.broadcast %24 : vector<1x4xf32> to vector<8x4xf32>
    %26 = arith.addf %23, %25 : vector<8x4xf32>
    %c0_23 = arith.constant 0 : index
    %c0_24 = arith.constant 0 : index
    %27 = vector.load %arg10[%c0_23, %c0_24] : memref<8x4xf32, #tpu.memory_space<vmem>>, vector<8x4xf32>
    tpu.vector_store %arg10[%c0_23, %c0_24], %26 {strides = array<i32>} : memref<8x4xf32, #tpu.memory_space<vmem>>, vector<8x4xf32>,
    return
  }
  func.func @transform_0(%arg0: i32) -> (i32, i32) {
    %c0_i32 = arith.constant 0 : i32
    %c0_i32_0 = arith.constant 0 : i32
    return %arg0, %c0_i32 : i32, i32
  }
  func.func @transform_1(%arg0: i32) -> (i32, i32) {
    %c0_i32 = arith.constant 0 : i32
    %c0_i32_0 = arith.constant 0 : i32
    %c0_i32_1 = arith.constant 0 : i32
    return %c0_i32, %c0_i32_0 : i32, i32
  }
  func.func @transform_2(%arg0: i32) -> (i32, i32) {
    %c0_i32 = arith.constant 0 : i32
    %c0_i32_0 = arith.constant 0 : i32
    %c0_i32_1 = arith.constant 0 : i32
    return %c0_i32, %c0_i32_0 : i32, i32
  }
  func.func @transform_3(%arg0: i32) -> (i32, i32) {
    %c0_i32 = arith.constant 0 : i32
    %c0_i32_0 = arith.constant 0 : i32
    %c0_i32_1 = arith.constant 0 : i32
    return %c0_i32, %c0_i32_0 : i32, i32
  }
  func.func @transform_4(%arg0: i32) -> (i32, i32) {
    %c0_i32 = arith.constant 0 : i32
    %c0_i32_0 = arith.constant 0 : i32
    %c0_i32_1 = arith.constant 0 : i32
    return %c0_i32, %c0_i32_0 : i32, i32
  }
  func.func @transform_5(%arg0: i32) -> (i32, i32) {
    %c0_i32 = arith.constant 0 : i32
    %c0_i32_0 = arith.constant 0 : i32
    %c0_i32_1 = arith.constant 0 : i32
    return %c0_i32, %c0_i32_0 : i32, i32
  }
  func.func @transform_6(%arg0: i32) -> (i32, i32) {
    %c0_i32 = arith.constant 0 : i32
    %c0_i32_0 = arith.constant 0 : i32
    %c0_i32_1 = arith.constant 0 : i32
    return %c0_i32, %c0_i32_0 : i32, i32
  }
  func.func @transform_7(%arg0: i32) -> (i32, i32) {
    %c0_i32 = arith.constant 0 : i32
    %c0_i32_0 = arith.constant 0 : i32
    %c0_i32_1 = arith.constant 0 : i32
    return %c0_i32, %c0_i32_0 : i32, i32
  }
  func.func @transform_8(%arg0: i32) -> (i32, i32) {
    %c0_i32 = arith.constant 0 : i32
    %c0_i32_0 = arith.constant 0 : i32
    %c0_i32_1 = arith.constant 0 : i32
    return %c0_i32, %c0_i32_0 : i32, i32
  }
  func.func @transform_9(%arg0: i32) -> (i32, i32) {
    %c0_i32 = arith.constant 0 : i32
    %c0_i32_0 = arith.constant 0 : i32
    return %arg0, %c0_i32 : i32, i32
  }
}

</mosaic_0001>

<bundles_post_ra>
// kernel: dqn_forward.1
= control target key start
LH: loop header
LB: loop body
LE: loop exit
PB: predicated region body
PF: predicated region fallthrough
CT: control target
= control target key end

     0   :  { %vm41_vm0 = vcmask 64512   ;;  %v503_v0 = vmov 0.0   ;;  %vm504_vm1 = vmmov 0   ;;  %vm225_vm2 = vcmask 523264   ;;  %s697_s1 = inlined_call_operand.vmem [shape: f32[8,128], index: 1, kind: input, shape index: {}]   ;;  %s698_s0 = inlined_call_operand.vmem [shape: f32[8,8], index: 0, kind: input, shape index: {}]   ;;  %s699_s3 = inlined_call_operand.vmem [shape: f32[128,64], index: 3, kind: input, shape index: {}]   ;;  %s700_s5 = inlined_call_operand.vmem [shape: f32[64,32], index: 5, kind: input, shape index: {}]   ;;  %s701_s2 = inlined_call_operand.vmem [shape: f32[1,128], index: 2, kind: input, shape index: {}]   ;;  %s702_s4 = inlined_call_operand.vmem [shape: f32[1,64], index: 4, kind: input, shape index: {}]   ;;  %s703_s7 = inlined_call_operand.vmem [shape: f32[32,4], index: 7, kind: input, shape index: {}]   ;;  %s704_s6 = inlined_call_operand.vmem [shape: f32[1,32], index: 6, kind: input, shape index: {}]   ;;  %s705_s8 = inlined_call_operand.vmem [shape: f32[1,4], index: 8, kind: input, shape index: {}]   ;;  %s706_s9 = inlined_call_operand.vmem [shape: f32[8,4], index: 9, kind: output, shape index: {}]  }
   0x1   :  { %431 = vmatprep.subr.mxu0 %v503_v0  ;;  %v33_v1 = vld [vmem:[%s697_s1] sm:$0xff]  ;;  %433 = vmatprep.mubr.msk.f32.mxu0 %vm504_vm1, %v503_v0  ;;  %v131_v3 = vld [vmem:[%s699_s3 + $0x78] sm:$0xff]  ;;  %v130_v4 = vld [vmem:[%s699_s3 + $0x70] sm:$0xff]  ;;  %vm311_vm3 = vcmask 261120   ;;  %vm385_vm4 = vcmask 31744  }
   0x2   :  { %v32_v2 = vld [vmem:[%s698_s0] sm:$0xff]  ;;  %432 = vmatpush3.msra.mxu0 %v33_v1  ;;  %436 = vmatprep.subr.mxu1 %v503_v0  ;;  %v129_v5 = vld [vmem:[%s699_s3 + $0x68] sm:$0xff]  ;;  %v127_v7 = vld [vmem:[%s699_s3 + $0x58] sm:$0xff] }
   0x3   :  { %434 = vmatmul.mubr.msk.f32.vlgmr.msra.gmra.mxu0 %vm41_vm0, %v32_v2  ;;  %437 = vmatpush3.msra.mxu1 %v131_v3  ;;  %v128_v6 = vld [vmem:[%s699_s3 + $0x60] sm:$0xff]  ;;  %v126_v8 = vld [vmem:[%s699_s3 + $0x50] sm:$0xff]  ;;  %v125_v9 = vld [vmem:[%s699_s3 + $0x48] sm:$0xff] }
   0x4   :  { %438 = vmatprep.subr.mxu1 %v503_v0  ;;  %468 = vmatprep.mubr.msk.f32.mxu1 %vm504_vm1, %v503_v0  ;;  %v124_v10 = vld [vmem:[%s699_s3 + $0x40] sm:$0xff]  ;;  %v123_v11 = vld [vmem:[%s699_s3 + $0x38] sm:$0xff]  ;;  %v122_v12 = vld [vmem:[%s699_s3 + $0x30] sm:$0xff] }
   0x5   :  { %439 = vmatpush3.msra.mxu1 %v130_v4  ;;  %471 = vmatprep.subr.mxu0 %v503_v0  ;;  %v121_v13 = vld [vmem:[%s699_s3 + $0x28] sm:$0xff]  ;;  %v120_v14 = vld [vmem:[%s699_s3 + $0x20] sm:$0xff]  ;;  %v119_v15 = vld [vmem:[%s699_s3 + $0x18] sm:$0xff] }
   0x6   :  { %440 = vmatprep.subr.mxu1 %v503_v0  ;;  %487 = vmatprep.mubr.msk.f32.mxu0 %vm504_vm1, %v503_v0  ;;  %v118_v16 = vld [vmem:[%s699_s3 + $0x10] sm:$0xff]  ;;  %v117_v17 = vld [vmem:[%s699_s3 + $0x8] sm:$0xff]  ;;  %v116_v18 = vld [vmem:[%s699_s3] sm:$0xff] }
   0x7   :  { %441 = vmatpush3.msra.mxu1 %v129_v5  ;;  %v217_v19 = vld [vmem:[%s700_s5 + $0x38] sm:$0xff]  ;;  %v216_v20 = vld [vmem:[%s700_s5 + $0x30] sm:$0xff]  ;;  %v215_v21 = vld [vmem:[%s700_s5 + $0x28] sm:$0xff] }
   0x8   :  { %442 = vmatprep.subr.mxu1 %v503_v0  ;;  %472 = vmatpush3.msra.mxu0 %v217_v19  ;;  %v214_v22 = vld [vmem:[%s700_s5 + $0x20] sm:$0xff]  ;;  %v213_v23 = vld [vmem:[%s700_s5 + $0x18] sm:$0xff]  ;;  %v212_v29 = vld [vmem:[%s700_s5 + $0x10] sm:$0xff] }
   0x9   :  { %443 = vmatpush3.msra.mxu1 %v128_v6  ;;  %473 = vmatprep.subr.mxu0 %v503_v0  ;;  %v391_v24 = vld [vmem:[%s701_s2] ss:$0 sm:$0xff]  ;;  %v211_v30 = vld [vmem:[%s700_s5 + $0x8] sm:$0xff]  ;;  %v303_v37 = vld [vmem:[%s703_s7 + $0x18] sm:$0xff] }
   0xa   :  { %444 = vmatprep.subr.mxu1 %v503_v0  ;;  %474 = vmatpush3.msra.mxu0 %v216_v20  ;;  %v210_v31 = vld [vmem:[%s700_s5] sm:$0xff]  ;;  %v302_v38 = vld [vmem:[%s703_s7 + $0x10] sm:$0xff]  ;;  %v301_v39 = vld [vmem:[%s703_s7 + $0x8] sm:$0xff] }
   0xb   :  { %445 = vmatpush3.msra.mxu1 %v127_v7  ;;  %475 = vmatprep.subr.mxu0 %v503_v0  ;;  %v393_v32 = vld [vmem:[%s702_s4] ss:$0 sm:$0xff] }
   0xc   :  { %446 = vmatprep.subr.mxu1 %v503_v0  ;;  %476 = vmatpush3.msra.mxu0 %v215_v21  ;;  %v300_v40 = vld [vmem:[%s703_s7] sm:$0xff] }
   0xd   :  { %447 = vmatpush3.msra.mxu1 %v126_v8  ;;  %477 = vmatprep.subr.mxu0 %v503_v0  ;;  %v394_v41 = vld [vmem:[%s704_s6] ss:$0 sm:$0xff] }
   0xe   :  { %448 = vmatprep.subr.mxu1 %v503_v0  ;;  %478 = vmatpush3.msra.mxu0 %v214_v22  ;;  %v396_v46 = vld [vmem:[%s705_s8] ss:$0 sm:$0xff] }
   0xf   :  { %449 = vmatpush3.msra.mxu1 %v125_v9  ;;  %479 = vmatprep.subr.mxu0 %v503_v0 }
  0x10   :  { %450 = vmatprep.subr.mxu1 %v503_v0  ;;  %480 = vmatpush3.msra.mxu0 %v213_v23 }
  0x11   :  { %451 = vmatpush3.msra.mxu1 %v124_v10  ;;  %481 = vmatprep.subr.mxu0 %v503_v0 }
  0x12   :  { %452 = vmatprep.subr.mxu1 %v503_v0  ;;  %482 = vmatpush3.msra.mxu0 %v212_v29 }
  0x13   :  { %453 = vmatpush3.msra.mxu1 %v123_v11  ;;  %483 = vmatprep.subr.mxu0 %v503_v0 }
  0x14   :  { %454 = vmatprep.subr.mxu1 %v503_v0  ;;  %484 = vmatpush3.msra.mxu0 %v211_v30 }
  0x15   :  { %455 = vmatpush3.msra.mxu1 %v122_v12  ;;  %485 = vmatprep.subr.mxu0 %v503_v0 }
  0x16   :  { %456 = vmatprep.subr.mxu1 %v503_v0  ;;  %486 = vmatpush3.msra.mxu0 %v210_v31 }
  0x17   :  { %457 = vmatpush3.msra.mxu1 %v121_v13  ;;  %490 = vmatprep.subr.mxu0 %v503_v0 }
  0x18   :  { %458 = vmatprep.subr.mxu1 %v503_v0 }
  0x19   :  { %459 = vmatpush3.msra.mxu1 %v120_v14 }
  0x1a   :  { %460 = vmatprep.subr.mxu1 %v503_v0 }
  0x1b   :  { %461 = vmatpush3.msra.mxu1 %v119_v15 }
  0x1c   :  { %462 = vmatprep.subr.mxu1 %v503_v0 }
  0x1d   :  { %463 = vmatpush3.msra.mxu1 %v118_v16 }
  0x1e   :  { %464 = vmatprep.subr.mxu1 %v503_v0 }
  0x1f   :  { %465 = vmatpush3.msra.mxu1 %v117_v17 }
  0x20   :  { %466 = vmatprep.subr.mxu1 %v503_v0 }
  0x21   :  { %467 = vmatpush3.msra.mxu1 %v116_v18 }
  0xc3   :  { %v111_v25 = vpop.f32.mrf.mxu0 }
  0xc4   :  { %v112_v26 = vadd.f32 %v391_v24, %v111_v25 }
  0xc5   :  { %v435_v27 = vpop.f32.mrf.mxu0 }
  0xc6   :  { %v115_v28 = vmax.f32 %v112_v26, 0.0 }
  0xc8   :  { %469 = vmatmul.mubr.f32.vlgmr.msra.gmra.mxu1 %v115_v28 }
 0x188   :  { %v205_v33 = vpop.f32.mrf.mxu1 }
 0x189   :  { %v206_v34 = vadd.f32 %v393_v32, %v205_v33 }
 0x18a   :  { %v470_v35 = vpop.f32.mrf.mxu1 }
 0x18b   :  { %v209_v36 = vmax.f32 %v206_v34, 0.0 }
 0x18d   :  { %488 = vmatmul.mubr.msk.f32.vlgmr.msra.gmra.mxu0 %vm225_vm2, %v209_v36 }
 0x18e   :  { %491 = vmatpush3.msra.mxu0 %v303_v37  ;;  %498 = vmatprep.mubr.msk.f32.mxu0 %vm504_vm1, %v503_v0 }
 0x18f   :  { %492 = vmatprep.subr.mxu0 %v503_v0 }
 0x190   :  { %493 = vmatpush3.msra.mxu0 %v302_v38 }
 0x191   :  { %494 = vmatprep.subr.mxu0 %v503_v0 }
 0x192   :  { %495 = vmatpush3.msra.mxu0 %v301_v39 }
 0x193   :  { %496 = vmatprep.subr.mxu0 %v503_v0 }
 0x194   :  { %497 = vmatpush3.msra.mxu0 %v300_v40 }
 0x24d   :  { %v295_v42 = vpop.f32.mrf.mxu0 }
 0x24e   :  { %v296_v43 = vadd.f32 %v394_v41, %v295_v42 }
 0x24f   :  { %v489_v44 = vpop.f32.mrf.mxu0 }
 0x250   :  { %v299_v45 = vmax.f32 %v296_v43, 0.0 }
 0x252   :  { %499 = vmatmul.mubr.msk.f32.vlgmr.msra.gmra.mxu0 %vm311_vm3, %v299_v45 }
 0x312   :  { %v381_v47 = vpop.f32.mrf.mxu0 }
 0x313   :  { %v382_v48 = vadd.f32 %v396_v46, %v381_v47 }
 0x314   :  { %v500_v49 = vpop.f32.mrf.mxu0 }
 0x315   :  { %386 = vst.msk [vmem:[%s706_s9] sm:$0xff] %vm385_vm4, %v382_v48 }

</bundles_post_ra>
